<compile_context>
chip_gen: v7x
topology: tpu7x:2x2x1
jax: 0.10.0
libtpu: 0.0.40
codegen_flags: <defaults>
</compile_context>

<pallas_src>
import functools

import jax
import jax.numpy as jnp
from jax.experimental import pallas as pl
from jax.experimental.pallas import tpu as pltpu


def _ce_kernel(out_ref, lab_ref, msk_ref, loss_ref, m_sc, l_sc, acc_sc, *,
               vocab_size):
    # out_ref : (1, TS, TV)  logits tile, native dtype (bf16/f32)
    # lab_ref : (1, TS, 1)   int32
    # msk_ref : (1, TS, 1)   float32
    # loss_ref: (1, TS, 1)   float32 per-token masked loss (written on last V tile)
    # m_sc / l_sc / acc_sc : (TS, 1) float32 online-logsumexp / label-logit carry
    v = pl.program_id(2)
    nv = pl.num_programs(2)
    _, TS, TV = out_ref.shape

    @pl.when(v == 0)
    def _():
        m_sc[...] = jnp.full_like(m_sc, -jnp.inf)
        l_sc[...] = jnp.zeros_like(l_sc)
        acc_sc[...] = jnp.zeros_like(acc_sc)

    labels = lab_ref[0]                                        # (TS, 1) int32

    # Lane ids for this V tile + ragged-tail validity mask.
    lane = jax.lax.broadcasted_iota(jnp.int32, (1, TV), 1) + v * TV   # (1, TV)
    valid = lane < vocab_size                                         # (1, TV)

    # Native-dtype tile; padded lanes -> large finite negative (NOT -inf, so
    # the exp(m_old - m_new) rescale of the carry can never produce NaN).
    logits_nat = out_ref[0]                                    # (TS, TV)
    neg_fill = jnp.asarray(-1e30, dtype=logits_nat.dtype)
    logits_nat = jnp.where(valid, logits_nat, neg_fill)

    # --- online logsumexp update over the V tiles --------------------------
    # max / compare run on the native dtype (exact under the monotone cast);
    # only the exp path is f32.
    tile_max = jnp.max(logits_nat, axis=1, keepdims=True).astype(jnp.float32)
    m_new = jnp.maximum(m_sc[...], tile_max)                   # (TS, 1)
    logits_f32 = logits_nat.astype(jnp.float32)                # (TS, TV)
    l_sc[...] = l_sc[...] * jnp.exp(m_sc[...] - m_new) + jnp.sum(
        jnp.exp(logits_f32 - m_new), axis=1, keepdims=True)
    m_sc[...] = m_new

    # --- label-logit gather: lane iota + tile offset, native-dtype select --
    # (at most one nonzero per row -> native-dtype sum is exact)
    hit = (lane == labels) & valid                             # (TS, TV)
    sel = jnp.where(hit, logits_nat, jnp.zeros_like(logits_nat))
    acc_sc[...] += jnp.sum(sel, axis=1, keepdims=True).astype(jnp.float32)

    # --- finalize on the last V tile ----------------------------------------
    @pl.when(v == nv - 1)
    def _():
        mask = msk_ref[0].astype(jnp.float32)                  # (TS, 1)
        tok = (m_sc[...] + jnp.log(l_sc[...])) - acc_sc[...]
        # Tokens with out-of-range labels (e.g. -100) get acc==0; they must be
        # masked out (mask==0), which zeroes them here.
        loss_ref[0] = tok * mask


def _pick_s_tile(dim, target, align):
    """Largest tile <= target that divides `dim` and is a multiple of `align`;
    falls back to the full dim (always legal for a TPU BlockSpec)."""
    if dim <= target:
        return dim
    t = (target // align) * align
    while t >= align:
        if dim % t == 0:
            return t
        t -= align
    return dim


def _pick_v_tile(dim, target):
    """V tile: full dim if small, else a multiple of 128 <= target.  Prefers an
    exact divisor (no ragged tail) but only if it is >= target/2; otherwise the
    last tile is ragged and masked inside the kernel."""
    if dim <= target:
        return dim
    t = max(128, (target // 128) * 128)
    d = t
    while d >= max(128, t // 2):
        if dim % d == 0:
            return d
        d -= 128
    return t


@functools.partial(jax.jit, static_argnames=("ts", "tv"))
def cross_entropy_loss(outputs, labels, mask, *, ts=None, tv=None):
    """outputs: (B, S, V) float (any dtype, e.g. bf16); labels: (B, S) int;
    mask: (B, S) float.  Returns sum(masked token CE) / B (float32 scalar)."""
    B, S, V = outputs.shape
    itemsize = jnp.dtype(outputs.dtype).itemsize
    # Dtype-aware sublane alignment for the sequence tile.
    s_align = {4: 8, 2: 16, 1: 32}.get(itemsize, 8)
    TS = ts if ts is not None else _pick_s_tile(S, 256, s_align)
    if tv is not None:
        TV = tv
    else:
        # Grow TV first: target ~8 MiB of logits per grid step, capped at 8192
        # lanes so the working set stays under v7x's 64 MiB VMEM.
        tgt = max(1024, min(8192, (8 << 20) // max(TS * itemsize, 1)))
        TV = _pick_v_tile(V, tgt)
    assert S % TS == 0, (S, TS)
    nv = pl.cdiv(V, TV)

    # Labels / mask side-tensors are tiny; the logits stay in native dtype.
    labels3 = labels.astype(jnp.int32).reshape(B, S, 1)
    mask3 = mask.astype(jnp.float32).reshape(B, S, 1)

    # Scoped-VMEM budget: double-buffered native logits tile + ~4 f32-tile
    # temporaries (f32 copy, exp term, select/compare temps) + headroom,
    # clamped to [32 MiB, 64 MiB] (64 MiB = v7x physical VMEM per core).
    f32_tile = TS * TV * 4
    vmem_need = 2 * TS * TV * itemsize + 4 * f32_tile + (2 << 20)
    vmem_limit = int(min(max(vmem_need, 32 << 20), 64 << 20))

    kernel = functools.partial(_ce_kernel, vocab_size=V)

    per_tok = pl.pallas_call(
        kernel,
        out_shape=jax.ShapeDtypeStruct((B, S, 1), jnp.float32),
        grid_spec=pltpu.PrefetchScalarGridSpec(
            num_scalar_prefetch=0,
            grid=(B, S // TS, nv),
            in_specs=[
                pl.BlockSpec((1, TS, TV), lambda b, s, v: (b, s, v)),
                pl.BlockSpec((1, TS, 1), lambda b, s, v: (b, s, 0)),
                pl.BlockSpec((1, TS, 1), lambda b, s, v: (b, s, 0)),
            ],
            out_specs=pl.BlockSpec((1, TS, 1), lambda b, s, v: (b, s, 0)),
            scratch_shapes=[
                pltpu.VMEM((TS, 1), jnp.float32),   # running max m
                pltpu.VMEM((TS, 1), jnp.float32),   # running exp-sum l
                pltpu.VMEM((TS, 1), jnp.float32),   # running label logit
            ],
        ),
        compiler_params=pltpu.CompilerParams(
            # V is the reduction (accumulator-resident) axis; B and S tiles are
            # independent -> megacore-shardable, harmless on single-TC chips.
            dimension_semantics=("parallel", "parallel", "arbitrary"),
            vmem_limit_bytes=vmem_limit),
    )(outputs, labels3, mask3)

    # Reduce per-token partials outside and divide by batch_size (module spec).
    return jnp.sum(per_tok) / jnp.float32(B)


def _reference(outputs, labels, mask):
    # Pure-JAX reference for verification.
    logits = outputs.astype(jnp.float32)
    lse = jax.nn.logsumexp(logits, axis=-1)                        # (B, S)
    lab_logit = jnp.take_along_axis(
        logits, labels[..., None].astype(jnp.int32), axis=-1)[..., 0]
    loss = jnp.sum((lse - lab_logit) * mask.astype(jnp.float32))
    return loss / outputs.shape[0]


if __name__ == "__main__":
    key = jax.random.PRNGKey(0)
    k1, k2, k3, k4, k5, k6, k7, k8, k9 = jax.random.split(key, 9)

    # --- small single-tile case (B=2, S=8, V=32), f32 ----------------------
    B, S, V = 2, 8, 32
    outputs = jax.random.normal(k1, (B, S, V), dtype=jnp.float32)
    labels = jax.random.randint(k2, (B, S), 0, V, dtype=jnp.int32)
    mask = (jax.random.uniform(k3, (B, S)) > 0.25).astype(jnp.float32)

    loss = cross_entropy_loss(outputs, labels, mask)
    jax.block_until_ready(loss)
    ref = _reference(outputs, labels, mask)
    assert jnp.allclose(loss, ref, rtol=1e-5, atol=1e-5), (loss, ref)

    # --- multi-tile case exercising the online-logsumexp carry, bf16 logits --
    B2, S2, V2 = 2, 16, 256
    out_bf = jax.random.normal(k4, (B2, S2, V2), dtype=jnp.float32
                               ).astype(jnp.bfloat16)
    lab2 = jax.random.randint(k5, (B2, S2), 0, V2, dtype=jnp.int32)
    msk2 = (jax.random.uniform(k6, (B2, S2)) > 0.25).astype(jnp.float32)

    loss2 = cross_entropy_loss(out_bf, lab2, msk2, ts=8, tv=128)
    jax.block_until_ready(loss2)
    ref2 = _reference(out_bf, lab2, msk2)
    assert jnp.allclose(loss2, ref2, rtol=2e-2, atol=2e-2), (loss2, ref2)

    # --- ragged-V case (V not a multiple of TV) exercising the lane mask ----
    B3, S3, V3 = 2, 8, 160
    out3 = jax.random.normal(k7, (B3, S3, V3), dtype=jnp.float32)
    lab3 = jax.random.randint(k8, (B3, S3), 0, V3, dtype=jnp.int32)
    msk3 = (jax.random.uniform(k9, (B3, S3)) > 0.25).astype(jnp.float32)

    loss3 = cross_entropy_loss(out3, lab3, msk3, ts=8, tv=128)
    jax.block_until_ready(loss3)
    ref3 = _reference(out3, lab3, msk3)
    assert jnp.allclose(loss3, ref3, rtol=1e-5, atol=1e-5), (loss3, ref3)

    print("KERNEL_OK")
</pallas_src>

<mosaic_0001>
module attributes {stable_mosaic.version = 11 : i64} {
  func.func @_ce_kernel(%arg0: i32, %arg1: i32, %arg2: i32, %arg3: memref<1x8x32xf32, #tpu.memory_space<vmem>>, %arg4: memref<1x8x1xi32, #tpu.memory_space<vmem>>, %arg5: memref<1x8x1xf32, #tpu.memory_space<vmem>>, %arg6: memref<1x8x1xf32, #tpu.memory_space<vmem>>, %arg7: memref<8x1xf32, #tpu.memory_space<vmem>>, %arg8: memref<8x1xf32, #tpu.memory_space<vmem>>, %arg9: memref<8x1xf32, #tpu.memory_space<vmem>>) attributes {dimension_semantics = [#tpu.dimension_semantics<parallel>, #tpu.dimension_semantics<parallel>, #tpu.dimension_semantics<arbitrary>], iteration_bounds = array<i64: 2, 1, 1>, scalar_prefetch = 0 : i64, scratch_operands = 3 : i64, tpu.core_type = #tpu.core_type<tc>, window_params = [{transform_indices = @transform_0, window_bounds = array<i64: 1, 8, 32>}, {transform_indices = @transform_1, window_bounds = array<i64: 1, 8, 1>}, {transform_indices = @transform_2, window_bounds = array<i64: 1, 8, 1>}, {transform_indices = @transform_3, window_bounds = array<i64: 1, 8, 1>}]} {
    %c0_i32 = arith.constant 0 : i32
    %0 = arith.cmpi eq, %arg2, %c0_i32 : i32
    %1 = arith.extui %0 : i1 to i32
    %c0_i32_0 = arith.constant 0 : i32
    %2 = arith.cmpi ne, %1, %c0_i32_0 : i32
    scf.if %2 {
      %cst_27 = arith.constant 0xFF800000 : f32
      %49 = vector.broadcast %cst_27 : f32 to vector<8x1xf32>
      %c0_28 = arith.constant 0 : index
      %c0_29 = arith.constant 0 : index
      %50 = vector.load %arg7[%c0_28, %c0_29] : memref<8x1xf32, #tpu.memory_space<vmem>>, vector<8x1xf32>
      tpu.vector_store %arg7[%c0_28, %c0_29], %49 {strides = array<i32>} : memref<8x1xf32, #tpu.memory_space<vmem>>, vector<8x1xf32>,
      %cst_30 = arith.constant 0.000000e+00 : f32
      %51 = vector.broadcast %cst_30 : f32 to vector<8x1xf32>
      %c0_31 = arith.constant 0 : index
      %c0_32 = arith.constant 0 : index
      %52 = vector.load %arg8[%c0_31, %c0_32] : memref<8x1xf32, #tpu.memory_space<vmem>>, vector<8x1xf32>
      tpu.vector_store %arg8[%c0_31, %c0_32], %51 {strides = array<i32>} : memref<8x1xf32, #tpu.memory_space<vmem>>, vector<8x1xf32>,
      %cst_33 = arith.constant 0.000000e+00 : f32
      %53 = vector.broadcast %cst_33 : f32 to vector<8x1xf32>
      %c0_34 = arith.constant 0 : index
      %c0_35 = arith.constant 0 : index
      %54 = vector.load %arg9[%c0_34, %c0_35] : memref<8x1xf32, #tpu.memory_space<vmem>>, vector<8x1xf32>
      tpu.vector_store %arg9[%c0_34, %c0_35], %53 {strides = array<i32>} : memref<8x1xf32, #tpu.memory_space<vmem>>, vector<8x1xf32>,
    } else {
    }
    %c0 = arith.constant 0 : index
    %c0_1 = arith.constant 0 : index
    %c0_2 = arith.constant 0 : index
    %3 = vector.load %arg4[%c0, %c0_1, %c0_2] : memref<1x8x1xi32, #tpu.memory_space<vmem>>, vector<1x8x1xi32>
    %4 = vector.shape_cast %3 : vector<1x8x1xi32> to vector<8x1xi32>
    %5 = tpu.iota {dimensions = array<i32: 1>} : vector<1x32xi32>
    %c32_i32 = arith.constant 32 : i32
    %6 = arith.muli %arg2, %c32_i32 : i32
    %7 = vector.broadcast %6 : i32 to vector<1x32xi32>
    %8 = arith.addi %5, %7 : vector<1x32xi32>
    %c32_i32_3 = arith.constant 32 : i32
    %9 = vector.broadcast %c32_i32_3 : i32 to vector<1x32xi32>
    %10 = arith.cmpi slt, %8, %9 : vector<1x32xi32>
    %c0_4 = arith.constant 0 : index
    %c0_5 = arith.constant 0 : index
    %c0_6 = arith.constant 0 : index
    %11 = vector.load %arg3[%c0_4, %c0_5, %c0_6] : memref<1x8x32xf32, #tpu.memory_space<vmem>>, vector<1x8x32xf32>
    %12 = vector.shape_cast %11 : vector<1x8x32xf32> to vector<8x32xf32>
    %cst = arith.constant -1.000000e+30 : f32
    %13 = vector.shape_cast %10 : vector<1x32xi1> to vector<1x32xi1>
    %14 = vector.broadcast %13 : vector<1x32xi1> to vector<8x32xi1>
    %15 = vector.broadcast %cst : f32 to vector<8x32xf32>
    %16 = arith.select %14, %12, %15 : vector<8x32xi1>, vector<8x32xf32>
    %cst_7 = arith.constant dense<0xFF800000> : vector<8xf32>
    %17 = vector.multi_reduction <maximumf>, %16, %cst_7 [1] : vector<8x32xf32> to vector<8xf32>
    %18 = vector.shape_cast %17 : vector<8xf32> to vector<8x1xf32>
    %c0_8 = arith.constant 0 : index
    %c0_9 = arith.constant 0 : index
    %19 = vector.load %arg7[%c0_8, %c0_9] : memref<8x1xf32, #tpu.memory_space<vmem>>, vector<8x1xf32>
    %20 = arith.maximumf %19, %18 : vector<8x1xf32>
    %c0_10 = arith.constant 0 : index
    %c0_11 = arith.constant 0 : index
    %21 = vector.load %arg8[%c0_10, %c0_11] : memref<8x1xf32, #tpu.memory_space<vmem>>, vector<8x1xf32>
    %c0_12 = arith.constant 0 : index
    %c0_13 = arith.constant 0 : index
    %22 = vector.load %arg7[%c0_12, %c0_13] : memref<8x1xf32, #tpu.memory_space<vmem>>, vector<8x1xf32>
    %23 = arith.subf %22, %20 : vector<8x1xf32>
    %24 = math.exp %23 : vector<8x1xf32>
    %25 = arith.mulf %21, %24 : vector<8x1xf32>
    %26 = vector.broadcast %20 : vector<8x1xf32> to vector<8x32xf32>
    %27 = arith.subf %16, %26 : vector<8x32xf32>
    %28 = math.exp %27 : vector<8x32xf32>
    %cst_14 = arith.constant dense<0.000000e+00> : vector<8xf32>
    %29 = vector.multi_reduction <add>, %28, %cst_14 [1] : vector<8x32xf32> to vector<8xf32>
    %30 = vector.shape_cast %29 : vector<8xf32> to vector<8x1xf32>
    %31 = arith.addf %25, %30 : vector<8x1xf32>
    %c0_15 = arith.constant 0 : index
    %c0_16 = arith.constant 0 : index
    %32 = vector.load %arg8[%c0_15, %c0_16] : memref<8x1xf32, #tpu.memory_space<vmem>>, vector<8x1xf32>
    tpu.vector_store %arg8[%c0_15, %c0_16], %31 {strides = array<i32>} : memref<8x1xf32, #tpu.memory_space<vmem>>, vector<8x1xf32>,
    %c0_17 = arith.constant 0 : index
    %c0_18 = arith.constant 0 : index
    %33 = vector.load %arg7[%c0_17, %c0_18] : memref<8x1xf32, #tpu.memory_space<vmem>>, vector<8x1xf32>
    tpu.vector_store %arg7[%c0_17, %c0_18], %20 {strides = array<i32>} : memref<8x1xf32, #tpu.memory_space<vmem>>, vector<8x1xf32>,
    %34 = vector.broadcast %8 : vector<1x32xi32> to vector<8x32xi32>
    %35 = vector.broadcast %4 : vector<8x1xi32> to vector<8x32xi32>
    %36 = arith.cmpi eq, %34, %35 : vector<8x32xi32>
    %37 = vector.broadcast %10 : vector<1x32xi1> to vector<8x32xi1>
    %38 = arith.andi %36, %37 : vector<8x32xi1>
    %cst_19 = arith.constant 0.000000e+00 : f32
    %39 = vector.broadcast %cst_19 : f32 to vector<8x32xf32>
    %40 = arith.select %38, %16, %39 : vector<8x32xi1>, vector<8x32xf32>
    %c0_20 = arith.constant 0 : index
    %c0_21 = arith.constant 0 : index
    %41 = vector.load %arg9[%c0_20, %c0_21] : memref<8x1xf32, #tpu.memory_space<vmem>>, vector<8x1xf32>
    %cst_22 = arith.constant dense<0.000000e+00> : vector<8xf32>
    %42 = vector.multi_reduction <add>, %40, %cst_22 [1] : vector<8x32xf32> to vector<8xf32>
    %43 = vector.shape_cast %42 : vector<8xf32> to vector<8x1xf32>
    %44 = arith.addf %41, %43 : vector<8x1xf32>
    %c0_23 = arith.constant 0 : index
    %c0_24 = arith.constant 0 : index
    %45 = vector.load %arg9[%c0_23, %c0_24] : memref<8x1xf32, #tpu.memory_space<vmem>>, vector<8x1xf32>
    tpu.vector_store %arg9[%c0_23, %c0_24], %44 {strides = array<i32>} : memref<8x1xf32, #tpu.memory_space<vmem>>, vector<8x1xf32>,
    %c0_i32_25 = arith.constant 0 : i32
    %46 = arith.cmpi eq, %arg2, %c0_i32_25 : i32
    %47 = arith.extui %46 : i1 to i32
    %c0_i32_26 = arith.constant 0 : i32
    %48 = arith.cmpi ne, %47, %c0_i32_26 : i32
    scf.if %48 {
      %c0_27 = arith.constant 0 : index
      %c0_28 = arith.constant 0 : index
      %c0_29 = arith.constant 0 : index
      %49 = vector.load %arg5[%c0_27, %c0_28, %c0_29] : memref<1x8x1xf32, #tpu.memory_space<vmem>>, vector<1x8x1xf32>
      %50 = vector.shape_cast %49 : vector<1x8x1xf32> to vector<8x1xf32>
      %c0_30 = arith.constant 0 : index
      %c0_31 = arith.constant 0 : index
      %51 = vector.load %arg7[%c0_30, %c0_31] : memref<8x1xf32, #tpu.memory_space<vmem>>, vector<8x1xf32>
      %c0_32 = arith.constant 0 : index
      %c0_33 = arith.constant 0 : index
      %52 = vector.load %arg8[%c0_32, %c0_33] : memref<8x1xf32, #tpu.memory_space<vmem>>, vector<8x1xf32>
      %53 = math.log %52 : vector<8x1xf32>
      %54 = arith.addf %51, %53 : vector<8x1xf32>
      %c0_34 = arith.constant 0 : index
      %c0_35 = arith.constant 0 : index
      %55 = vector.load %arg9[%c0_34, %c0_35] : memref<8x1xf32, #tpu.memory_space<vmem>>, vector<8x1xf32>
      %56 = arith.subf %54, %55 : vector<8x1xf32>
      %57 = arith.mulf %56, %50 : vector<8x1xf32>
      %c0_36 = arith.constant 0 : index
      %c0_37 = arith.constant 0 : index
      %c0_38 = arith.constant 0 : index
      %58 = vector.load %arg6[%c0_36, %c0_37, %c0_38] : memref<1x8x1xf32, #tpu.memory_space<vmem>>, vector<1x8x1xf32>
      %59 = vector.shape_cast %58 : vector<1x8x1xf32> to vector<8x1xf32>
      %60 = vector.shape_cast %57 : vector<8x1xf32> to vector<1x8x1xf32>
      tpu.vector_store %arg6[%c0_36, %c0_37, %c0_38], %60 {strides = array<i32>} : memref<1x8x1xf32, #tpu.memory_space<vmem>>, vector<1x8x1xf32>,
    } else {
    }
    return
  }
  func.func @transform_0(%arg0: i32, %arg1: i32, %arg2: i32) -> (i32, i32, i32) {
    %c0_i32 = arith.constant 0 : i32
    return %arg0, %arg1, %arg2 : i32, i32, i32
  }
  func.func @transform_1(%arg0: i32, %arg1: i32, %arg2: i32) -> (i32, i32, i32) {
    %c0_i32 = arith.constant 0 : i32
    %c0_i32_0 = arith.constant 0 : i32
    return %arg0, %arg1, %c0_i32 : i32, i32, i32
  }
  func.func @transform_2(%arg0: i32, %arg1: i32, %arg2: i32) -> (i32, i32, i32) {
    %c0_i32 = arith.constant 0 : i32
    %c0_i32_0 = arith.constant 0 : i32
    return %arg0, %arg1, %c0_i32 : i32, i32, i32
  }
  func.func @transform_3(%arg0: i32, %arg1: i32, %arg2: i32) -> (i32, i32, i32) {
    %c0_i32 = arith.constant 0 : i32
    %c0_i32_0 = arith.constant 0 : i32
    return %arg0, %arg1, %c0_i32 : i32, i32, i32
  }
}

</mosaic_0001>

<bundles_post_ra>
// kernel: cross_entropy_loss.1
= control target key start
LH: loop header
LB: loop body
LE: loop exit
PB: predicated region body
PF: predicated region fallthrough
CT: control target
= control target key end

     0   :  { %s544_s12 = smov 0   ;;  %s546_s13 = smov 0   ;;  %s601_s0 = inlined_call_operand.vmem [shape: f32[2,8,32], index: 0, kind: input, shape index: {}]   ;;  %s602_s1 = inlined_call_operand.vmem [shape: s32[2,8,1], index: 1, kind: input, shape index: {}]   ;;  %s603_s2 = inlined_call_operand.vmem [shape: f32[2,8,1], index: 2, kind: input, shape index: {}]   ;;  %s604_s3 = inlined_call_operand.vmem [shape: f32[2,8,1], index: 3, kind: output, shape index: {}]  }
   0x1   :  { %s548_s14 = smov 0  }
   0x2 LB: > { %s32_s15 = sadd.s32 1, %s515_s13  ;;  %p455_p0 = scmp.ge.s32.totalorder %s519_s14, 1  ;;  %s519_s14 = sphi %s548_s14, %s13_s14   ;;  %s515_s13 = sphi %s546_s13, %s606_s13   ;;  %s511_s12 = sphi %s544_s12, %s605_s12  }
   0x3   : > { %p34_p1 = scmp.ge.s32.totalorder %s32_s15, 2  ;;  %p195_p2 = scmp.lt.s32.totalorder %s519_s14, 3 }
   0x5   : > { %s608_s15 = smov (%p34_p1, %s32_s15), 0  ;;  %p196_p3 = pnand %p455_p0, %p195_p2 }
   0x6   : > { %p240_p4 = scmp.lt.s32.totalorder (!%p196_p3), %s511_s12, 1  ;;  %v280_v0 = vlaneseq (!%p196_p3)  ;;  %vm275_vm0 = vcmask (!%p196_p3), 7168   ;;  %v521_v1 = vmov (!%p196_p3), -inf   ;;  %vm290_vm2 = vcmask (!%p196_p3), 261120  }
   0x7   : > { %199 = sbr.rel (%p196_p3) target bundleno = 480 (0x1e0), region = 32  ;;  %276 = vst.msk [vmem:[#allocation2] sm:$0xff] (!%p196_p3), %vm275_vm0, %v521_v1  ;;  %v522_v6 = vmov (!%p196_p3), 0   ;;  %v523_v7 = vmov (!%p196_p3), 0.0  }
   0x8   : > { %v281_v2 = vand.u32 (!%p196_p3), 127, %v280_v0  ;;  %489 = vset.pattern.permute.xlu0 (!%p196_p3), %v522_v6  ;;  %490 = vset.pattern.permute.xlu1 (!%p196_p3), %v522_v6  ;;  %277 = vst.msk [vmem:[#allocation3] sm:$0xff] (!%p196_p3), %vm275_vm0, %v523_v7  ;;  %278 = vst.msk [vmem:[#allocation4] sm:$0xff] (!%p196_p3), %vm275_vm0, %v523_v7 }
   0xa   : > { %vm285_vm1 = vcmp.lt.s32.totalorder (!%p196_p3), %v281_v2, 32 }
   0xe   : > { %s610_s12 = smov (!%p240_p4, %s511_s12), 1  ;;  %v294_v9 = vld [vmem:[#allocation2] sm:$0xff] }
   0xf   : > { %s563_s16 = sshll.u32 %s610_s12, 3  ;;  %v296_v23 = vld [vmem:[#allocation3] sm:$0xff]  ;;  %v322_v27 = vld [vmem:[#allocation4] sm:$0xff] }
  0x10   : > { %s249_s19 = scalar_lea.vmem %s601_s0, %s563_s16  ;;  %s256_s22 = scalar_lea.vmem %s602_s1, %s563_s16 }
  0x11   : > { %v286_v3 = vld [vmem:[%s249_s19] sm:$0xff]  ;;  %s263_s25 = scalar_lea.vmem %s603_s2, %s563_s16  ;;  %s270_s28 = scalar_lea.vmem %s604_s3, %s563_s16 }
  0x12   : > { %v289_v4 = vsel %vm285_vm1, %v286_v3, -1e+30  ;;  %v279_v8 = vld [vmem:[%s256_s22] sm:$0xff] }
  0x13   : > { %v291_v5 = vsel %vm290_vm2, %v289_v4, -inf  ;;  %317 = vperm.xlu1 %490, %v279_v8   ;;  %v331_v36 = vld [vmem:[%s263_s25] sm:$0xff] }
  0x14   : > { %292 = vmax.xlane.f32.xlu0 %v291_v5 }
  0x92   : > { %v318_v16 = vpop.permute.xlu1 %317 }
  0x93   : > { %vm319_vm3 = vcmp.eq.s32.totalorder %v281_v2, %v318_v16 }
  0x94   : > { %vm320_vm4 = vmand %vm319_vm3, %vm285_vm1 }
  0x95   : > { %v321_v18 = vsel %vm320_vm4, %v289_v4, 0.0 }
  0x96   : > { %v323_v20 = vsel %vm290_vm2, %v321_v18, 0.0 }
  0xa1   : > { %v293_v10 = vpop.xlane.xlu0 %292 }
  0xa2   : > { %v295_v11 = vmax.f32 %v294_v9, %v293_v10 }
  0xa4   : > { %v297_v12 = vsub.f32 %v294_v9, %v295_v11  ;;  %315 = vst.msk [vmem:[#allocation2] sm:$0xff] %vm275_vm0, %v295_v11  ;;  %303 = vperm.xlu0 %489, %v295_v11  }
  0xa6   : > { %v298_v21 = vmul.f32 1.442695, %v297_v12 }
  0xab   : > { %v332_v33 = vld [vmem:[#allocation2] sm:$0xff] }
 0x123   : > { %v304_v13 = vpop.permute.xlu0 %303 }
 0x124   : > { %v306_v14 = vsub.f32 %v289_v4, %v304_v13 }
 0x126   : > { %v307_v15 = vmul.f32 1.442695, %v306_v14 }
 0x128   : > { %491 = vpow2.f32 %v307_v15 }
 0x129   : > { %493 = vpow2.f32 %v298_v21 }
 0x132   : > { %v492_v17 = vpop.eup %491 }
 0x133   : > { %v309_v19 = vsel %vm290_vm2, %v492_v17, 0.0  ;;  %v494_v22 = vpop.eup %493 }
 0x134   : > { %310 = vadd.xlane.f32.xlu1 %v309_v19  ;;  %v300_v24 = vmul.f32 %v494_v22, %v296_v23 }
 0x138   : > { %324 = vadd.xlane.f32.xlu1 %v323_v20 }
 0x1c1   : > { %v311_v25 = vpop.xlane.xlu1 %310 }
 0x1c2   : > { %v312_v26 = vadd.f32 %v311_v25, %v300_v24 }
 0x1c4   : > { %314 = vst.msk [vmem:[#allocation3] sm:$0xff] %vm275_vm0, %v312_v26 }
 0x1c5   : > { %v325_v28 = vpop.xlane.xlu1 %324 }
 0x1c6   : > { %v326_v29 = vadd.f32 %v325_v28, %v322_v27 }
 0x1c8   : > { %327 = vst.msk [vmem:[#allocation4] sm:$0xff] %vm275_vm0, %v326_v29 }
 0x1cb   : > { %v333_v30 = vld [vmem:[#allocation3] sm:$0xff] }
 0x1cc   : > { %495 = vlog2.f32 %v333_v30 }
 0x1cf   : > { %v337_v34 = vld [vmem:[#allocation4] sm:$0xff] }
 0x1d6   : > { %v496_v31 = vpop.eup %495 }
 0x1d7   : > { %v335_v32 = vmul.f32 0.6931472, %v496_v31 }
 0x1d9   : > { %v336_v35 = vadd.f32 %v335_v32, %v332_v33 }
 0x1db   : > { %v338_v37 = vsub.f32 %v336_v35, %v337_v34 }
 0x1dd   : > { %v339_v38 = vmul.f32 %v338_v37, %v331_v36 }
 0x1df   : > { %340 = vst.msk [vmem:[%s270_s28] sm:$0xff] %vm275_vm0, %v339_v38 }
 0x1e0 PF: > { %s13_s14 = sadd.s32 1, %s519_s14   ;;  %s605_s12 = smov %s515_s13 }
 0x1e1   : > { %p10_p5 = scmp.ge.s32.totalorder %s13_s14, 4   ;;  %s606_s13 = smov %s608_s15 }
 0x1e3   :  { %12 = sbr.rel (!%p10_p5) target bundleno = 2 (0x2), region = 76 }

</bundles_post_ra>
